<compile_context>
chip_gen: v5e
topology: v5e:2x2
jax: 0.10.0
libtpu: 0.0.40
codegen_flags: <defaults>
</compile_context>

<pallas_src>
import numpy as np
import jax
import jax.numpy as jnp
from jax import lax
from jax.experimental import pallas as pl
from jax.experimental.pallas import tpu as pltpu


SIZES = (1, 2, 3, 6)

_KPAD_MULT = 16           # sublane alignment of the pool-matrix rows (bf16-safe)
_TN_MAX = 32768           # cap on the lane tile
_VMEM_BUDGET = 24 << 20   # working-set budget for the double-buffered tiles
_VMEM_LIMIT = 32 << 20    # scoped VMEM limit handed to Mosaic (>= v5e's 16MiB default)


def _round_up(a, b):
    return (a + b - 1) // b * b


def _pool_configs(sizes=SIZES):
    """Mirror the PyTorch __init__: (kernel, stride) per pyramid level."""
    cfgs = []
    for size in sizes:
        if 8 % size == 0:
            k = 8 // size
            cfgs.append((k, k))          # AvgPool2d(kernel_size=k), stride=k
        else:
            cfgs.append((4, 2))          # AvgPool2d(kernel_size=4, stride=2)
    return cfgs


def _build_pool_matrix_t(H, W, sizes=SIZES):
    """P^T[row, h*W+w] = 1/(k*k) if (h,w) lies in window `row`, else 0.

    Duplicate (k, s) levels (sizes 3 and 6 are both AvgPool2d(4, 2)) are stored
    once, and the row count is padded with zero rows up to a multiple of 16 so
    the kernel's (K, TN) output tile is sublane-aligned.  Returns
    (P^T, level_slices) with level_slices[l] = (offset, count) in P^T's rows.
    """
    cfgs = _pool_configs(sizes)
    rows = []
    level_slices = []
    uniq = {}
    offset = 0
    for (k, s) in cfgs:
        if (k, s) in uniq:                       # dedupe size=3 / size=6
            level_slices.append(uniq[(k, s)])
            continue
        out_h = (H - k) // s + 1
        out_w = (W - k) // s + 1
        for oh in range(out_h):
            for ow in range(out_w):
                col = np.zeros((H, W), dtype=np.float32)
                col[oh * s: oh * s + k, ow * s: ow * s + k] = 1.0 / (k * k)
                rows.append(col.reshape(H * W))
        uniq[(k, s)] = (offset, out_h * out_w)
        level_slices.append((offset, out_h * out_w))
        offset += out_h * out_w
    k_real = len(rows)
    k_pad = _round_up(k_real, _KPAD_MULT)
    for _ in range(k_pad - k_real):              # zero rows -> aligned stores
        rows.append(np.zeros(H * W, dtype=np.float32))
    Pt = np.stack(rows, axis=0)                  # (Kpad, H*W)
    return Pt, level_slices


def _pick_tile_n(N, itemsize):
    """Largest lane tile fitting the VMEM budget; keep >=2 grid steps when
    there is enough work (v7x dual-TensorCore sharding of the parallel axis)."""
    # Per TN row: x tile lane-padded 64->128 lanes + (Kpad, TN) out tile,
    # both double-buffered by the BlockSpec pipeline.
    per_row = 2 * (128 + _KPAD_MULT) * itemsize
    tn_cap = (_VMEM_BUDGET // per_row) // 128 * 128
    tn_cap = max(128, min(_TN_MAX, tn_cap))
    if N < 256:                                  # tiny problem: one full block
        return N
    n_steps = max(2, pl.cdiv(N, tn_cap))
    tn = _round_up(pl.cdiv(N, n_steps), 128)
    return min(tn, tn_cap)


def _spp_pool_kernel(x_ref, pt_ref, o_ref):
    # x_ref: (TN, H*W)   pt_ref: (Kpad, H*W)   o_ref: (Kpad, TN)
    acc = lax.dot_general(
        pt_ref[...], x_ref[...],
        dimension_numbers=(((1,), (1,)), ((), ())),   # contract on H*W axis
        preferred_element_type=jnp.float32,           # f32 MXU accumulation
    )
    o_ref[...] = acc.astype(o_ref.dtype)


@jax.jit
def spp_module_avg(x):
    """Pallas implementation of SPPModuleAvg.forward.  x: (B, C, H, W)."""
    B, C, H, W = x.shape
    HW = H * W
    N = B * C

    Pt_np, level_slices = _build_pool_matrix_t(H, W)
    Kpad = Pt_np.shape[0]
    Pt = jnp.asarray(Pt_np, dtype=x.dtype)   # 1/4, 1/16, 1/64 are exact in bf16

    # Flatten NCHW -> (N, H*W): a pure view of the contiguous input.
    x2 = x.reshape(N, HW)

    TN = _pick_tile_n(N, x2.dtype.itemsize)
    grid = (pl.cdiv(N, TN),)                 # ragged last block: the garbage
                                             # tail columns are never written.

    bytes_accessed = (N * HW + Kpad * HW + Kpad * N) * x.dtype.itemsize

    yt = pl.pallas_call(
        _spp_pool_kernel,
        out_shape=jax.ShapeDtypeStruct((Kpad, N), x.dtype),
        grid=grid,
        in_specs=[
            pl.BlockSpec((TN, HW), lambda i: (i, 0)),
            pl.BlockSpec((Kpad, HW), lambda i: (0, 0)),   # resident ~8 KB constant
        ],
        out_specs=pl.BlockSpec((Kpad, TN), lambda i: (0, i)),
        compiler_params=pltpu.CompilerParams(
            dimension_semantics=("parallel",),
            vmem_limit_bytes=_VMEM_LIMIT),
        cost_estimate=pl.CostEstimate(
            flops=2 * N * HW * Kpad,
            transcendentals=0,
            bytes_accessed=bytes_accessed),
    )(x2, Pt)

    # Replay torch.cat(dim=1) of the per-level nn.Flatten outputs:
    # (Kpad, B*C) -> (B, 23*C, 1, 1).  The size=3 / size=6 duplicate block is a
    # re-slice of the same 9 deduplicated rows; under jit the per-level
    # slice+transpose fuse into the concatenate, so this is one output pass.
    # TODO(synk): writing the final layout straight from the kernel needs a
    # (C, K_l) -> (C*K_l,) lane merge that Mosaic may refuse to lower.
    pieces = []
    for (off, cnt) in level_slices:
        piece = yt[off:off + cnt].reshape(cnt, B, C)       # (K_l, B, C)
        pieces.append(piece.transpose(1, 2, 0).reshape(B, C * cnt))
    out = jnp.concatenate(pieces, axis=1)
    return out.reshape(B, out.shape[1], 1, 1)


def _reference_spp(x):
    """Pure-JAX reference (lax.reduce_window based), computed in f32."""
    B, C, H, W = x.shape
    xf = x.astype(jnp.float32)
    pieces = []
    for (k, s) in _pool_configs():
        summed = lax.reduce_window(
            xf, 0.0, lax.add,
            window_dimensions=(1, 1, k, k),
            window_strides=(1, 1, s, s),
            padding="VALID")
        avg = summed / float(k * k)              # (B, C, oh, ow)
        pieces.append(avg.reshape(B, -1))        # flatten per block
    out = jnp.concatenate(pieces, axis=1)
    return out.reshape(B, out.shape[1], 1, 1)


def _check(x, rtol, atol):
    out = jax.block_until_ready(spp_module_avg(x))
    ref = jax.block_until_ready(_reference_spp(x))
    assert out.shape == ref.shape, (out.shape, ref.shape)
    assert out.dtype == x.dtype, out.dtype
    np.testing.assert_allclose(np.asarray(out, dtype=np.float32),
                               np.asarray(ref, dtype=np.float32),
                               rtol=rtol, atol=atol)
    return out


if __name__ == "__main__":
    key = jax.random.PRNGKey(0)

    # Primary small case: 8x8 spatial matches the module's `8 // size` design.
    B, C, H, W = 2, 4, 8, 8
    x = jax.random.normal(key, (B, C, H, W), dtype=jnp.float32)
    # Tolerance covers the MXU's default f32 path (which may use bf16 passes);
    # layout/indexing bugs would produce O(1) errors and still be caught.
    out = _check(x, rtol=2e-2, atol=2e-2)
    assert out.shape == (B, 23 * C, 1, 1), out.shape

    # bf16 path (no wrapper upcast; halves HBM read traffic; f32 MXU accumulate).
    x_bf16 = x.astype(jnp.bfloat16)
    out_bf16 = _check(x_bf16, rtol=2e-2, atol=2e-2)
    assert out_bf16.shape == (B, 23 * C, 1, 1), out_bf16.shape

    # Ragged-N case: N = B*C = 480 -> TN = 256, grid = 2 with a partial last
    # block (exercises the no-pad edge handling and multi-step pipeline).
    key2 = jax.random.PRNGKey(0)
    x_big = jax.random.normal(key2, (3, 160, 8, 8), dtype=jnp.float32)
    out_big = _check(x_big, rtol=2e-2, atol=2e-2)
    assert out_big.shape == (3, 23 * 160, 1, 1), out_big.shape

    print("KERNEL_OK")
</pallas_src>

<mosaic_0001>
module attributes {stable_mosaic.version = 11 : i64} {
  func.func @_spp_pool_kernel(%arg0: i32, %arg1: memref<8x64xf32, #tpu.memory_space<vmem>>, %arg2: memref<16x64xf32, #tpu.memory_space<vmem>>, %arg3: memref<16x8xf32, #tpu.memory_space<vmem>>) attributes {dimension_semantics = [#tpu.dimension_semantics<parallel>], iteration_bounds = array<i64: 1>, scalar_prefetch = 0 : i64, scratch_operands = 0 : i64, tpu.core_type = #tpu.core_type<tc>, window_params = [{transform_indices = @transform_0, window_bounds = array<i64: 8, 64>}, {pipeline_mode = #tpu.pipeline_mode<synchronous>, transform_indices = @transform_1, window_bounds = array<i64: 16, 64>}, {transform_indices = @transform_2, window_bounds = array<i64: 16, 8>}]} {
    %c0 = arith.constant 0 : index
    %c0_0 = arith.constant 0 : index
    %0 = vector.load %arg2[%c0, %c0_0] : memref<16x64xf32, #tpu.memory_space<vmem>>, vector<16x64xf32>
    %c0_1 = arith.constant 0 : index
    %c0_2 = arith.constant 0 : index
    %1 = vector.load %arg1[%c0_1, %c0_2] : memref<8x64xf32, #tpu.memory_space<vmem>>, vector<8x64xf32>
    %cst = arith.constant dense<0.000000e+00> : vector<16x8xf32>
    %2 = tpu.matmul %0, %1, %cst {dimension_numbers = #tpu.dot_dimension_numbers<[1], [1], [0], [0], [0, 0, 1, 0], [], []>} : vector<16x64xf32>, vector<8x64xf32>, vector<16x8xf32> -> vector<16x8xf32>
    %c0_3 = arith.constant 0 : index
    %c0_4 = arith.constant 0 : index
    %3 = vector.load %arg3[%c0_3, %c0_4] : memref<16x8xf32, #tpu.memory_space<vmem>>, vector<16x8xf32>
    tpu.vector_store %arg3[%c0_3, %c0_4], %2 {strides = array<i32>} : memref<16x8xf32, #tpu.memory_space<vmem>>, vector<16x8xf32>,
    return
  }
  func.func @transform_0(%arg0: i32) -> (i32, i32) {
    %c0_i32 = arith.constant 0 : i32
    %c0_i32_0 = arith.constant 0 : i32
    return %arg0, %c0_i32 : i32, i32
  }
  func.func @transform_1(%arg0: i32) -> (i32, i32) {
    %c0_i32 = arith.constant 0 : i32
    %c0_i32_0 = arith.constant 0 : i32
    %c0_i32_1 = arith.constant 0 : i32
    return %c0_i32, %c0_i32_0 : i32, i32
  }
  func.func @transform_2(%arg0: i32) -> (i32, i32) {
    %c0_i32 = arith.constant 0 : i32
    %c0_i32_0 = arith.constant 0 : i32
    return %c0_i32, %arg0 : i32, i32
  }
}

</mosaic_0001>

<bundles_post_ra>
// kernel: spp_module_avg.1
= control target key start
LH: loop header
LB: loop body
LE: loop exit
PB: predicated region body
PF: predicated region fallthrough
CT: control target
= control target key end

     0   :  { %vm14_vm0 = vcmask 523264   ;;  %vm47_vm1 = vcmask 64512   ;;  %s88_s0 = inlined_call_operand.vmem [shape: f32[8,64], index: 0, kind: input, shape index: {}]   ;;  %s89_s1 = inlined_call_operand.vmem [shape: f32[16,64], index: 1, kind: input, shape index: {}]   ;;  %s90_s2 = inlined_call_operand.vmem [shape: f32[16,8], index: 2, kind: output, shape index: {}]  }
   0x1   :  { %v13_v0 = vld [vmem:[%s88_s0] sm:$0xff]  ;;  %v12_v2 = vld [vmem:[%s89_s1 + $0x8] sm:$0xff] }
   0x2   :  { %54 = vmatpush.xpose.msk.msra.mxu0 %vm14_vm0, %v13_v0  ;;  %57 = vmatpush.xpose.msk.msra.mxu1 %vm14_vm0, %v13_v0  ;;  %v11_v1 = vld [vmem:[%s89_s1] sm:$0xff] }
   0x5   :  { %55 = vmatmul.msk.f32.vlgmr.msra.gmra.mxu0 %vm14_vm0, %v11_v1  ;;  %56 = vmatmul.msk.f32.vlgmr.msra.gmra.mxu1 %vm14_vm0, %v12_v2 }
  0x82   :  { %v41_v3 = vpop.f32.mrf.mxu0  ;;  %v44_v4 = vpop.f32.mrf.mxu1 }
  0x83   :  { %48 = vst.msk [vmem:[%s90_s2] sm:$0xff] %vm47_vm1, %v41_v3 }
  0x84   :  { %49 = vst.msk [vmem:[%s90_s2 + $0x8] sm:$0xff] %vm47_vm1, %v44_v4 }

</bundles_post_ra>
